<compile_context>
chip_gen: v7x
topology: tpu7x:2x2x1
jax: 0.10.0
libtpu: 0.0.40
codegen_flags: <defaults>
</compile_context>

<pallas_src>
import jax
import jax.numpy as jnp
from jax import lax
from jax.experimental import pallas as pl
from jax.experimental.pallas import tpu as pltpu

CIN = 3      # conv in-channels
COUT = 8     # conv out-channels
EPS = 1e-5   # BatchNorm eps


def fused_kernel(x_ref, p_ref, o_ref):
    """Fused 1x1-conv(+3) -> clamp*x/6 -> training-mode BatchNorm.

    Shapes (single whole-array block, lane-dense last dim = Hp*Wp):
      x_ref : (N, CIN,  M)       M = Hp*Wp (already zero-padded border)
      p_ref : (COUT, CIN + 3)    [ w | bias+3 | gamma | beta ]
      o_ref : (N, COUT, M)
    """
    n_batch, c_in, m = x_ref.shape
    c_out = o_ref.shape[1]

    p = p_ref[...]                                  # tiny (COUT, CIN+3)
    w = p[:, :c_in]                                 # (COUT, CIN)
    b3 = p[:, c_in:c_in + 1]                        # (COUT, 1)  bias with +3 folded
    gamma = p[:, c_in + 1:c_in + 2]                 # (COUT, 1)
    beta = p[:, c_in + 2:c_in + 3]                  # (COUT, 1)

    inv_cnt = jnp.float32(1.0 / (n_batch * m))

    # --- Pass 1: conv + activation (pure VPU broadcast FMAs), accumulate sums.
    sum_acc = jnp.zeros((c_out, 1), jnp.float32)
    for n in range(n_batch):                        # N is tiny & static -> unrolled
        xn = x_ref[n]                               # (CIN, M)
        v1 = b3
        for c in range(c_in):
            v1 = v1 + w[:, c:c + 1] * xn[c:c + 1, :]
        v5 = jnp.clip(v1, 0.0, 6.0) * v1 * jnp.float32(1.0 / 6.0)   # (COUT, M)
        o_ref[n] = v5                               # stash v5 (VMEM resident)
        sum_acc = sum_acc + jnp.sum(v5, axis=1, keepdims=True)
    mean = sum_acc * inv_cnt                        # (COUT, 1)

    # --- Pass 2: centered second moment (two-pass for numerical safety).
    var_acc = jnp.zeros((c_out, 1), jnp.float32)
    for n in range(n_batch):
        d = o_ref[n] - mean
        var_acc = var_acc + jnp.sum(d * d, axis=1, keepdims=True)
    var = var_acc * inv_cnt                         # biased variance (BN normalization)

    scale = gamma * lax.rsqrt(var + EPS)            # (COUT, 1)
    shift = beta - mean * scale                     # (COUT, 1)

    # --- Pass 3: normalize in place.
    for n in range(n_batch):
        o_ref[n] = o_ref[n] * scale + shift


def model_forward(x_nchw, w, b, gamma, beta):
    N, C, H, W = x_nchw.shape
    assert C == CIN
    Hp, Wp = H + 2, W + 2
    Mhw = Hp * Wp

    # Conv2d(kernel=1, padding=1): one tiny zero-pad of the spatial dims, then a
    # FREE minor-dim-merging reshape -> lane-dense (N, CIN, Hp*Wp). No transposes.
    xp = jnp.pad(x_nchw, ((0, 0), (0, 0), (1, 1), (1, 1)))
    x3 = xp.reshape(N, CIN, Mhw)

    # Pack all per-channel params into ONE small array -> a single DMA.
    params = jnp.concatenate(
        [w.reshape(COUT, CIN).astype(jnp.float32),
         (b.reshape(COUT, 1) + 3.0).astype(jnp.float32),   # fold the "+3" into bias
         gamma.reshape(COUT, 1).astype(jnp.float32),
         beta.reshape(COUT, 1).astype(jnp.float32)],
        axis=1)                                            # (COUT, CIN+3)

    flops = N * COUT * Mhw * (2 * CIN + 12)
    bytes_accessed = 4 * (x3.size + params.size + 4 * N * COUT * Mhw)

    # Whole problem in one invocation (no grid): even at 1x3x64x64 everything is
    # well under VMEM limits on v5e/v6e/v7x.  A tiled "parallel" two-phase-BN
    # variant is only needed if the activation grows to many MiB.
    out3 = pl.pallas_call(
        fused_kernel,
        out_shape=jax.ShapeDtypeStruct((N, COUT, Mhw), jnp.float32),
        in_specs=[
            pl.BlockSpec(memory_space=pltpu.MemorySpace.VMEM),
            pl.BlockSpec(memory_space=pltpu.MemorySpace.VMEM),
        ],
        out_specs=pl.BlockSpec(memory_space=pltpu.MemorySpace.VMEM),
        cost_estimate=pl.CostEstimate(
            flops=flops, transcendentals=COUT, bytes_accessed=bytes_accessed),
    )(x3, params)

    # Free view back to NCHW (no transpose, no slice).
    return out3.reshape(N, COUT, Hp, Wp)


if __name__ == "__main__":
    key = jax.random.PRNGKey(0)
    k1, k2, k3, k4, k5 = jax.random.split(key, 5)

    # small shapes consistent with the module (original: 1x3x64x64)
    N, H, W = 2, 16, 16
    x = jax.random.normal(k1, (N, CIN, H, W), jnp.float32)

    # deterministic parameters (Conv2d 1x1 weight/bias; BN affine params)
    w = jax.random.normal(k2, (COUT, CIN), jnp.float32) * 0.1
    b = jax.random.normal(k3, (COUT,), jnp.float32) * 0.1
    gamma = 1.0 + 0.1 * jax.random.normal(k4, (COUT,), jnp.float32)
    beta = 0.1 * jax.random.normal(k5, (COUT,), jnp.float32)

    out = jax.block_until_ready(model_forward(x, w, b, gamma, beta))
    assert out.shape == (N, COUT, H + 2, W + 2)

    # pure-JAX reference for correctness
    xp = jnp.pad(x, ((0, 0), (0, 0), (1, 1), (1, 1)))
    v1 = jnp.einsum("nchw,oc->nohw", xp, w) + b.reshape(1, COUT, 1, 1) + 3.0
    v5 = jnp.clip(v1, 0.0, 6.0) * v1 / 6.0
    mean = v5.mean(axis=(0, 2, 3), keepdims=True)
    var = v5.var(axis=(0, 2, 3), keepdims=True)
    ref = (v5 - mean) / jnp.sqrt(var + EPS) * gamma.reshape(1, COUT, 1, 1) \
        + beta.reshape(1, COUT, 1, 1)

    err = float(jnp.max(jnp.abs(out - ref)))
    assert jnp.allclose(out, ref, atol=1e-4, rtol=1e-4), err
    print("KERNEL_OK")
</pallas_src>

<mosaic_0001>
module attributes {stable_mosaic.version = 11 : i64} {
  func.func @fused_kernel(%arg0: memref<2x3x324xf32, #tpu.memory_space<vmem>>, %arg1: memref<8x6xf32, #tpu.memory_space<vmem>>, %arg2: memref<2x8x324xf32, #tpu.memory_space<vmem>>) attributes {dimension_semantics = [], scalar_prefetch = 0 : i64, scratch_operands = 0 : i64, tpu.core_type = #tpu.core_type<tc>} {
    %c0 = arith.constant 0 : index
    %c0_0 = arith.constant 0 : index
    %0 = vector.load %arg1[%c0, %c0_0] : memref<8x6xf32, #tpu.memory_space<vmem>>, vector<8x6xf32>
    %1 = vector.extract_strided_slice %0 {offsets = [0, 0], sizes = [8, 3], strides = [1, 1]} : vector<8x6xf32> to vector<8x3xf32>
    %2 = vector.extract_strided_slice %0 {offsets = [0, 3], sizes = [8, 1], strides = [1, 1]} : vector<8x6xf32> to vector<8x1xf32>
    %3 = vector.extract_strided_slice %0 {offsets = [0, 4], sizes = [8, 1], strides = [1, 1]} : vector<8x6xf32> to vector<8x1xf32>
    %4 = vector.extract_strided_slice %0 {offsets = [0, 5], sizes = [8, 1], strides = [1, 1]} : vector<8x6xf32> to vector<8x1xf32>
    %cst = arith.constant 0.000000e+00 : f32
    %5 = vector.broadcast %cst : f32 to vector<8x1xf32>
    %c0_1 = arith.constant 0 : index
    %c0_2 = arith.constant 0 : index
    %c0_3 = arith.constant 0 : index
    %6 = vector.load %arg0[%c0_1, %c0_2, %c0_3] : memref<2x3x324xf32, #tpu.memory_space<vmem>>, vector<1x3x324xf32>
    %7 = vector.shape_cast %6 : vector<1x3x324xf32> to vector<3x324xf32>
    %8 = vector.extract_strided_slice %1 {offsets = [0, 0], sizes = [8, 1], strides = [1, 1]} : vector<8x3xf32> to vector<8x1xf32>
    %9 = vector.extract_strided_slice %7 {offsets = [0, 0], sizes = [1, 324], strides = [1, 1]} : vector<3x324xf32> to vector<1x324xf32>
    %10 = vector.broadcast %8 : vector<8x1xf32> to vector<8x324xf32>
    %11 = vector.broadcast %9 : vector<1x324xf32> to vector<8x324xf32>
    %12 = arith.mulf %10, %11 : vector<8x324xf32>
    %13 = vector.broadcast %2 : vector<8x1xf32> to vector<8x324xf32>
    %14 = arith.addf %13, %12 : vector<8x324xf32>
    %15 = vector.extract_strided_slice %1 {offsets = [0, 1], sizes = [8, 1], strides = [1, 1]} : vector<8x3xf32> to vector<8x1xf32>
    %16 = vector.extract_strided_slice %7 {offsets = [1, 0], sizes = [1, 324], strides = [1, 1]} : vector<3x324xf32> to vector<1x324xf32>
    %17 = vector.broadcast %15 : vector<8x1xf32> to vector<8x324xf32>
    %18 = vector.broadcast %16 : vector<1x324xf32> to vector<8x324xf32>
    %19 = arith.mulf %17, %18 : vector<8x324xf32>
    %20 = arith.addf %14, %19 : vector<8x324xf32>
    %21 = vector.extract_strided_slice %1 {offsets = [0, 2], sizes = [8, 1], strides = [1, 1]} : vector<8x3xf32> to vector<8x1xf32>
    %22 = vector.extract_strided_slice %7 {offsets = [2, 0], sizes = [1, 324], strides = [1, 1]} : vector<3x324xf32> to vector<1x324xf32>
    %23 = vector.broadcast %21 : vector<8x1xf32> to vector<8x324xf32>
    %24 = vector.broadcast %22 : vector<1x324xf32> to vector<8x324xf32>
    %25 = arith.mulf %23, %24 : vector<8x324xf32>
    %26 = arith.addf %20, %25 : vector<8x324xf32>
    %cst_4 = arith.constant 0.000000e+00 : f32
    %cst_5 = arith.constant 6.000000e+00 : f32
    %27 = vector.broadcast %cst_4 : f32 to vector<8x324xf32>
    %28 = arith.maximumf %27, %26 : vector<8x324xf32>
    %29 = vector.broadcast %cst_5 : f32 to vector<8x324xf32>
    %30 = arith.minimumf %29, %28 : vector<8x324xf32>
    %31 = arith.mulf %30, %26 : vector<8x324xf32>
    %cst_6 = arith.constant 0.166666672 : f32
    %32 = vector.broadcast %cst_6 : f32 to vector<8x324xf32>
    %33 = arith.mulf %31, %32 : vector<8x324xf32>
    %c0_7 = arith.constant 0 : index
    %c0_8 = arith.constant 0 : index
    %c0_9 = arith.constant 0 : index
    %34 = vector.load %arg2[%c0_7, %c0_8, %c0_9] : memref<2x8x324xf32, #tpu.memory_space<vmem>>, vector<1x8x324xf32>
    %35 = vector.shape_cast %34 : vector<1x8x324xf32> to vector<8x324xf32>
    %36 = vector.shape_cast %33 : vector<8x324xf32> to vector<1x8x324xf32>
    tpu.vector_store %arg2[%c0_7, %c0_8, %c0_9], %36 {strides = array<i32>} : memref<2x8x324xf32, #tpu.memory_space<vmem>>, vector<1x8x324xf32>,
    %cst_10 = arith.constant dense<0.000000e+00> : vector<8xf32>
    %37 = vector.multi_reduction <add>, %33, %cst_10 [1] : vector<8x324xf32> to vector<8xf32>
    %38 = vector.shape_cast %37 : vector<8xf32> to vector<8x1xf32>
    %39 = arith.addf %5, %38 : vector<8x1xf32>
    %c1 = arith.constant 1 : index
    %c0_11 = arith.constant 0 : index
    %c0_12 = arith.constant 0 : index
    %40 = vector.load %arg0[%c1, %c0_11, %c0_12] : memref<2x3x324xf32, #tpu.memory_space<vmem>>, vector<1x3x324xf32>
    %41 = vector.shape_cast %40 : vector<1x3x324xf32> to vector<3x324xf32>
    %42 = vector.extract_strided_slice %1 {offsets = [0, 0], sizes = [8, 1], strides = [1, 1]} : vector<8x3xf32> to vector<8x1xf32>
    %43 = vector.extract_strided_slice %41 {offsets = [0, 0], sizes = [1, 324], strides = [1, 1]} : vector<3x324xf32> to vector<1x324xf32>
    %44 = vector.broadcast %42 : vector<8x1xf32> to vector<8x324xf32>
    %45 = vector.broadcast %43 : vector<1x324xf32> to vector<8x324xf32>
    %46 = arith.mulf %44, %45 : vector<8x324xf32>
    %47 = vector.broadcast %2 : vector<8x1xf32> to vector<8x324xf32>
    %48 = arith.addf %47, %46 : vector<8x324xf32>
    %49 = vector.extract_strided_slice %1 {offsets = [0, 1], sizes = [8, 1], strides = [1, 1]} : vector<8x3xf32> to vector<8x1xf32>
    %50 = vector.extract_strided_slice %41 {offsets = [1, 0], sizes = [1, 324], strides = [1, 1]} : vector<3x324xf32> to vector<1x324xf32>
    %51 = vector.broadcast %49 : vector<8x1xf32> to vector<8x324xf32>
    %52 = vector.broadcast %50 : vector<1x324xf32> to vector<8x324xf32>
    %53 = arith.mulf %51, %52 : vector<8x324xf32>
    %54 = arith.addf %48, %53 : vector<8x324xf32>
    %55 = vector.extract_strided_slice %1 {offsets = [0, 2], sizes = [8, 1], strides = [1, 1]} : vector<8x3xf32> to vector<8x1xf32>
    %56 = vector.extract_strided_slice %41 {offsets = [2, 0], sizes = [1, 324], strides = [1, 1]} : vector<3x324xf32> to vector<1x324xf32>
    %57 = vector.broadcast %55 : vector<8x1xf32> to vector<8x324xf32>
    %58 = vector.broadcast %56 : vector<1x324xf32> to vector<8x324xf32>
    %59 = arith.mulf %57, %58 : vector<8x324xf32>
    %60 = arith.addf %54, %59 : vector<8x324xf32>
    %cst_13 = arith.constant 0.000000e+00 : f32
    %cst_14 = arith.constant 6.000000e+00 : f32
    %61 = vector.broadcast %cst_13 : f32 to vector<8x324xf32>
    %62 = arith.maximumf %61, %60 : vector<8x324xf32>
    %63 = vector.broadcast %cst_14 : f32 to vector<8x324xf32>
    %64 = arith.minimumf %63, %62 : vector<8x324xf32>
    %65 = arith.mulf %64, %60 : vector<8x324xf32>
    %cst_15 = arith.constant 0.166666672 : f32
    %66 = vector.broadcast %cst_15 : f32 to vector<8x324xf32>
    %67 = arith.mulf %65, %66 : vector<8x324xf32>
    %c1_16 = arith.constant 1 : index
    %c0_17 = arith.constant 0 : index
    %c0_18 = arith.constant 0 : index
    %68 = vector.load %arg2[%c1_16, %c0_17, %c0_18] : memref<2x8x324xf32, #tpu.memory_space<vmem>>, vector<1x8x324xf32>
    %69 = vector.shape_cast %68 : vector<1x8x324xf32> to vector<8x324xf32>
    %70 = vector.shape_cast %67 : vector<8x324xf32> to vector<1x8x324xf32>
    tpu.vector_store %arg2[%c1_16, %c0_17, %c0_18], %70 {strides = array<i32>} : memref<2x8x324xf32, #tpu.memory_space<vmem>>, vector<1x8x324xf32>,
    %cst_19 = arith.constant dense<0.000000e+00> : vector<8xf32>
    %71 = vector.multi_reduction <add>, %67, %cst_19 [1] : vector<8x324xf32> to vector<8xf32>
    %72 = vector.shape_cast %71 : vector<8xf32> to vector<8x1xf32>
    %73 = arith.addf %39, %72 : vector<8x1xf32>
    %cst_20 = arith.constant 0.00154320989 : f32
    %74 = vector.broadcast %cst_20 : f32 to vector<8x1xf32>
    %75 = arith.mulf %73, %74 : vector<8x1xf32>
    %cst_21 = arith.constant 0.000000e+00 : f32
    %76 = vector.broadcast %cst_21 : f32 to vector<8x1xf32>
    %c0_22 = arith.constant 0 : index
    %c0_23 = arith.constant 0 : index
    %c0_24 = arith.constant 0 : index
    %77 = vector.load %arg2[%c0_22, %c0_23, %c0_24] : memref<2x8x324xf32, #tpu.memory_space<vmem>>, vector<1x8x324xf32>
    %78 = vector.shape_cast %77 : vector<1x8x324xf32> to vector<8x324xf32>
    %79 = vector.broadcast %75 : vector<8x1xf32> to vector<8x324xf32>
    %80 = arith.subf %78, %79 : vector<8x324xf32>
    %81 = arith.mulf %80, %80 : vector<8x324xf32>
    %cst_25 = arith.constant dense<0.000000e+00> : vector<8xf32>
    %82 = vector.multi_reduction <add>, %81, %cst_25 [1] : vector<8x324xf32> to vector<8xf32>
    %83 = vector.shape_cast %82 : vector<8xf32> to vector<8x1xf32>
    %84 = arith.addf %76, %83 : vector<8x1xf32>
    %c1_26 = arith.constant 1 : index
    %c0_27 = arith.constant 0 : index
    %c0_28 = arith.constant 0 : index
    %85 = vector.load %arg2[%c1_26, %c0_27, %c0_28] : memref<2x8x324xf32, #tpu.memory_space<vmem>>, vector<1x8x324xf32>
    %86 = vector.shape_cast %85 : vector<1x8x324xf32> to vector<8x324xf32>
    %87 = vector.broadcast %75 : vector<8x1xf32> to vector<8x324xf32>
    %88 = arith.subf %86, %87 : vector<8x324xf32>
    %89 = arith.mulf %88, %88 : vector<8x324xf32>
    %cst_29 = arith.constant dense<0.000000e+00> : vector<8xf32>
    %90 = vector.multi_reduction <add>, %89, %cst_29 [1] : vector<8x324xf32> to vector<8xf32>
    %91 = vector.shape_cast %90 : vector<8xf32> to vector<8x1xf32>
    %92 = arith.addf %84, %91 : vector<8x1xf32>
    %cst_30 = arith.constant 0.00154320989 : f32
    %93 = vector.broadcast %cst_30 : f32 to vector<8x1xf32>
    %94 = arith.mulf %92, %93 : vector<8x1xf32>
    %cst_31 = arith.constant 9.99999974E-6 : f32
    %95 = vector.broadcast %cst_31 : f32 to vector<8x1xf32>
    %96 = arith.addf %94, %95 : vector<8x1xf32>
    %97 = math.rsqrt %96 : vector<8x1xf32>
    %98 = arith.mulf %3, %97 : vector<8x1xf32>
    %99 = arith.mulf %75, %98 : vector<8x1xf32>
    %100 = arith.subf %4, %99 : vector<8x1xf32>
    %c0_32 = arith.constant 0 : index
    %c0_33 = arith.constant 0 : index
    %c0_34 = arith.constant 0 : index
    %101 = vector.load %arg2[%c0_32, %c0_33, %c0_34] : memref<2x8x324xf32, #tpu.memory_space<vmem>>, vector<1x8x324xf32>
    %102 = vector.shape_cast %101 : vector<1x8x324xf32> to vector<8x324xf32>
    %103 = vector.broadcast %98 : vector<8x1xf32> to vector<8x324xf32>
    %104 = arith.mulf %102, %103 : vector<8x324xf32>
    %105 = vector.broadcast %100 : vector<8x1xf32> to vector<8x324xf32>
    %106 = arith.addf %104, %105 : vector<8x324xf32>
    %c0_35 = arith.constant 0 : index
    %c0_36 = arith.constant 0 : index
    %c0_37 = arith.constant 0 : index
    %107 = vector.load %arg2[%c0_35, %c0_36, %c0_37] : memref<2x8x324xf32, #tpu.memory_space<vmem>>, vector<1x8x324xf32>
    %108 = vector.shape_cast %107 : vector<1x8x324xf32> to vector<8x324xf32>
    %109 = vector.shape_cast %106 : vector<8x324xf32> to vector<1x8x324xf32>
    tpu.vector_store %arg2[%c0_35, %c0_36, %c0_37], %109 {strides = array<i32>} : memref<2x8x324xf32, #tpu.memory_space<vmem>>, vector<1x8x324xf32>,
    %c1_38 = arith.constant 1 : index
    %c0_39 = arith.constant 0 : index
    %c0_40 = arith.constant 0 : index
    %110 = vector.load %arg2[%c1_38, %c0_39, %c0_40] : memref<2x8x324xf32, #tpu.memory_space<vmem>>, vector<1x8x324xf32>
    %111 = vector.shape_cast %110 : vector<1x8x324xf32> to vector<8x324xf32>
    %112 = vector.broadcast %98 : vector<8x1xf32> to vector<8x324xf32>
    %113 = arith.mulf %111, %112 : vector<8x324xf32>
    %114 = vector.broadcast %100 : vector<8x1xf32> to vector<8x324xf32>
    %115 = arith.addf %113, %114 : vector<8x324xf32>
    %c1_41 = arith.constant 1 : index
    %c0_42 = arith.constant 0 : index
    %c0_43 = arith.constant 0 : index
    %116 = vector.load %arg2[%c1_41, %c0_42, %c0_43] : memref<2x8x324xf32, #tpu.memory_space<vmem>>, vector<1x8x324xf32>
    %117 = vector.shape_cast %116 : vector<1x8x324xf32> to vector<8x324xf32>
    %118 = vector.shape_cast %115 : vector<8x324xf32> to vector<1x8x324xf32>
    tpu.vector_store %arg2[%c1_41, %c0_42, %c0_43], %118 {strides = array<i32>} : memref<2x8x324xf32, #tpu.memory_space<vmem>>, vector<1x8x324xf32>,
    return
  }
}

</mosaic_0001>

<bundles_post_ra>
// kernel: tpu_custom_call.1
= control target key start
LH: loop header
LB: loop body
LE: loop exit
PB: predicated region body
PF: predicated region fallthrough
CT: control target
= control target key end

     0   :  { %v414_v1 = vmov 0   ;;  %v415_v2 = vmov 1   ;;  %s504_s0 = inlined_call_operand.vmem [shape: f32[2,3,324], index: 0, kind: input, shape index: {}]   ;;  %s505_s1 = inlined_call_operand.vmem [shape: f32[8,6], index: 1, kind: input, shape index: {}]   ;;  %s506_s2 = inlined_call_operand.hbm [shape: f32[2,8,324], index: 2, kind: output, shape index: {}]  }
   0x1   :  { %v442_v0 = vld [vmem:[%s505_s1] sm:$0xff]  ;;  %381 = vset.pattern.permute.xlu0 %v414_v1  ;;  %383 = vset.pattern.permute.xlu1 %v415_v2 }
   0x2   :  { %17 = vperm.xlu0 %381, %v442_v0   ;;  %60 = vperm.xlu1 %383, %v442_v0  }
   0x3   :  { %7 = vsyncpa [#allocation3], 0  ;;  %v416_v3 = vmov 3   ;;  %v417_v4 = vmov 2   ;;  %v22_v5 = vlaneseq  ;;  %v13_v8 = vld [vmem:[%s504_s0] sm:$0x77] }
   0x4   :  { %v14_v10 = vld [vmem:[%s504_s0 + $0x8] sm:$0x7]  ;;  %v369_v13 = vld [vmem:[%s504_s0 + $0xc] sm:$0x77]  ;;  %v370_v15 = vld [vmem:[%s504_s0 + $0x14] sm:$0x7] }
   0x5   :  { %v23_v6 = vshrl.u32 %v22_v5, 7  ;;  %vm147_vm0 = vcmask 556032   ;;  %s420_s0 = smov 1   ;;  %s421_s18 = smov [#allocation2]  }
   0x6   :  { %382 = vset.pattern.permute.xlu0 %v416_v3  ;;  %384 = vset.pattern.permute.xlu1 %v417_v4  ;;  %s358_s19 = sshll.u32 %s421_s18, 4  ;;  %s359_s19 = int_to_ptr.vmem [resolvable:$true] %s358_s19 }
   0x7   :  { %53 = vperm.xlu0 %382, %v442_v0   ;;  %97 = vperm.xlu1 %384, %v442_v0   ;;  %v24_v7 = vsub.s32 0, %v23_v6  ;;  %v28_v9 = vsub.s32 4, %v23_v6  ;;  %v65_v12 = vsub.s32 1, %v23_v6  ;;  %v69_v16 = vsub.s32 5, %v23_v6  ;;  %s390_s20 = scalar_lea.vmem %s359_s19, 768  ;;  %p395_p1 = scmp.lt.s32.totalorder %s359_s19, %s359_s19 }
   0x8   :  { %v460_v17 = vsub.s32 2, %v23_v6  ;;  %v106_v18 = vsub.s32 6, %v23_v6  ;;  %p391_p0 = scmp.ne.s32.totalorder %s359_s19, %s390_s20  ;;  %p396_p2 = scmp.lt.s32.totalorder %s390_s20, %s390_s20 }
   0x9   :  { %v25_v11 = vrot.slane %v13_v8, %v24_v7  ;;  %v29_v14 = vrot.slane %v13_v8, %v28_v9  ;;  %v33_v19 = vrot.slane %v14_v10, %v24_v7  ;;  %v163_v20 = vrot.slane %v369_v13, %v24_v7 }
   0xa   :  { %v167_v22 = vrot.slane %v369_v13, %v28_v9  ;;  %v171_v23 = vrot.slane %v370_v15, %v24_v7  ;;  %v66_v24 = vrot.slane %v13_v8, %v65_v12  ;;  %v70_v26 = vrot.slane %v13_v8, %v69_v16  ;;  %p397_p3 = por %p396_p2, %p395_p1 }
   0xb   :  { %v40_v21 = vrot.slane %v25_v11, %v24_v7  ;;  %v44_v25 = vrot.slane %v29_v14, %v24_v7  ;;  %v196_v27 = vrot.slane %v369_v13, %v65_v12  ;;  %v200_v28 = vrot.slane %v369_v13, %v69_v16 }
   0xc   :  { %v204_v29 = vrot.slane %v370_v15, %v65_v12  ;;  %v229_v30 = vrot.slane %v369_v13, %v460_v17  ;;  %v233_v31 = vrot.slane %v369_v13, %v106_v18  ;;  %v74_v32 = vrot.slane %v14_v10, %v65_v12  ;;  %p398_p4 = pnand %p397_p3, %p391_p0 }
   0xd   :  { %v237_v33 = vrot.slane %v370_v15, %v460_v17  ;;  %v103_v34 = vrot.slane %v13_v8, %v460_v17  ;;  %v107_v35 = vrot.slane %v13_v8, %v106_v18  ;;  %v111_v36 = vrot.slane %v14_v10, %v460_v17 }
   0xe   :  { %v48_v37 = vrot.slane %v33_v19, %v24_v7  ;;  %v178_v38 = vrot.slane %v163_v20, %v24_v7  ;;  %v182_v39 = vrot.slane %v167_v22, %v24_v7  ;;  %v186_v40 = vrot.slane %v171_v23, %v24_v7 }
   0xf   :  { %v81_v42 = vrot.slane %v66_v24, %v65_v12  ;;  %v85_v43 = vrot.slane %v70_v26, %v65_v12  ;;  %v211_v44 = vrot.slane %v196_v27, %v65_v12  ;;  %v215_v45 = vrot.slane %v200_v28, %v65_v12 }
  0x10   :  { %v219_v47 = vrot.slane %v204_v29, %v65_v12  ;;  %v244_v48 = vrot.slane %v229_v30, %v460_v17  ;;  %v248_v49 = vrot.slane %v233_v31, %v460_v17  ;;  %v89_v50 = vrot.slane %v74_v32, %v65_v12 }
  0x11   :  { %v252_v51 = vrot.slane %v237_v33, %v460_v17  ;;  %v118_v52 = vrot.slane %v103_v34, %v460_v17  ;;  %v122_v53 = vrot.slane %v107_v35, %v460_v17  ;;  %v126_v54 = vrot.slane %v111_v36, %v460_v17 }
  0x81   :  { %v18_v41 = vpop.permute.xlu0 %17  ;;  %v61_v46 = vpop.permute.xlu1 %60 }
  0x82   :  { %v49_v55 = vmul.f32 %v40_v21, %v18_v41  ;;  %v50_v56 = vmul.f32 %v44_v25, %v18_v41  ;;  %v51_v57 = vmul.f32 %v48_v37, %v18_v41  ;;  %v187_v58 = vmul.f32 %v178_v38, %v18_v41 }
  0x83   :  { %v188_v59 = vmul.f32 %v182_v39, %v18_v41  ;;  %v189_v60 = vmul.f32 %v186_v40, %v18_v41  ;;  %v90_v61 = vmul.f32 %v81_v42, %v61_v46  ;;  %v91_v62 = vmul.f32 %v85_v43, %v61_v46 }
  0x84   :  { %v220_v63 = vmul.f32 %v211_v44, %v61_v46  ;;  %v221_v1 = vmul.f32 %v215_v45, %v61_v46  ;;  %v222_v4 = vmul.f32 %v219_v47, %v61_v46  ;;  %v92_v5 = vmul.f32 %v89_v50, %v61_v46 }
  0x86   :  { %v54_v2 = vpop.permute.xlu0 %53  ;;  %v98_v3 = vpop.permute.xlu1 %97 }
  0x87   :  { %v56_v6 = vadd.f32 %v54_v2, %v49_v55  ;;  %v57_v7 = vadd.f32 %v54_v2, %v50_v56  ;;  %v190_v8 = vadd.f32 %v187_v58, %v54_v2  ;;  %v191_v9 = vadd.f32 %v188_v59, %v54_v2 }
  0x88   :  { %v192_v10 = vadd.f32 %v189_v60, %v54_v2  ;;  %v253_v11 = vmul.f32 %v244_v48, %v98_v3  ;;  %v254_v12 = vmul.f32 %v248_v49, %v98_v3  ;;  %v255_v13 = vmul.f32 %v252_v51, %v98_v3 }
  0x89   :  { %v223_v14 = vadd.f32 %v220_v63, %v190_v8  ;;  %v224_v15 = vadd.f32 %v221_v1, %v191_v9  ;;  %v58_v16 = vadd.f32 %v54_v2, %v51_v57  ;;  %v93_v17 = vadd.f32 %v90_v61, %v56_v6 }
  0x8a   :  { %v225_v18 = vadd.f32 %v222_v4, %v192_v10  ;;  %v94_v19 = vadd.f32 %v91_v62, %v57_v7  ;;  %v127_v20 = vmul.f32 %v118_v52, %v98_v3  ;;  %v128_v21 = vmul.f32 %v122_v53, %v98_v3 }
  0x8b   :  { %v256_v22 = vadd.f32 %v253_v11, %v223_v14  ;;  %v257_v23 = vadd.f32 %v254_v12, %v224_v15  ;;  %v95_v24 = vadd.f32 %v92_v5, %v58_v16  ;;  %v129_v25 = vmul.f32 %v126_v54, %v98_v3 }
  0x8c   :  { %v258_v26 = vadd.f32 %v255_v13, %v225_v18  ;;  %v130_v27 = vadd.f32 %v127_v20, %v93_v17  ;;  %v131_v28 = vadd.f32 %v128_v21, %v94_v19  ;;  %v418_v21 = vmov 4  }
  0x8d   :  { %v259_v29 = vmax.f32 %v256_v22, 0.0  ;;  %v260_v30 = vmax.f32 %v257_v23, 0.0  ;;  %v132_v31 = vadd.f32 %v129_v25, %v95_v24  ;;  %385 = vset.pattern.permute.xlu1 %v418_v21 }
  0x8e   :  { %v261_v32 = vmax.f32 %v258_v26, 0.0  ;;  %v133_v33 = vmax.f32 %v130_v27, 0.0  ;;  %v134_v34 = vmax.f32 %v131_v28, 0.0 }
  0x8f   :  { %v262_v35 = vmin.f32 %v259_v29, 6.0  ;;  %v263_v36 = vmin.f32 %v260_v30, 6.0  ;;  %v135_v37 = vmax.f32 %v132_v31, 0.0 }
  0x90   :  { %v264_v38 = vmin.f32 %v261_v32, 6.0  ;;  %v136_v39 = vmin.f32 %v133_v33, 6.0  ;;  %v137_v40 = vmin.f32 %v134_v34, 6.0 }
  0x91   :  { %v265_v41 = vmul.f32 %v262_v35, %v256_v22  ;;  %v266_v42 = vmul.f32 %v263_v36, %v257_v23  ;;  %v138_v43 = vmin.f32 %v135_v37, 6.0 }
  0x92   :  { %v267_v44 = vmul.f32 %v264_v38, %v258_v26  ;;  %v139_v45 = vmul.f32 %v136_v39, %v130_v27  ;;  %v140_v46 = vmul.f32 %v137_v40, %v131_v28  ;;  %v419_v27 = vmov 5  }
  0x93   :  { %v472_v47 = vmul.f32 0.16666667, %v265_v41  ;;  %v474_v48 = vmul.f32 0.16666667, %v266_v42  ;;  %v141_v49 = vmul.f32 %v138_v43, %v132_v31  ;;  %387 = vset.pattern.permute.xlu0 %v419_v27 }
  0x94   :  { %v270_v50 = vmul.f32 0.16666667, %v267_v44  ;;  %v142_v51 = vmul.f32 0.16666667, %v139_v45  ;;  %v143_v52 = vmul.f32 0.16666667, %v140_v46 }
  0x95   :  { %v275_v53 = vadd.f32 %v474_v48, %v472_v47  ;;  %v144_v54 = vmul.f32 0.16666667, %v141_v49 }
  0x96   :  { %274 = vst.msk [vmem:[#allocation2 + $0x28] sm:$0xff] %vm147_vm0, %v270_v50  ;;  %v276_v55 = vsel %vm147_vm0, %v270_v50, 0.0  ;;  %v149_v56 = vadd.f32 %v143_v52, %v142_v51 }
  0x97   :  { %v277_v57 = vadd.f32 %v276_v55, %v275_v53  ;;  %148 = vst.msk [vmem:[#allocation2 + $0x10] sm:$0xff] %vm147_vm0, %v144_v54  ;;  %v150_v58 = vsel %vm147_vm0, %v144_v54, 0.0 }
  0x98   :  { %v151_v59 = vadd.f32 %v150_v58, %v149_v56 }
  0x99   :  { %278 = vadd.xlane.f32.xlu0 %v277_v57 }
  0x9a   :  { %152 = vadd.xlane.f32.xlu1 %v151_v59 }
  0x9d   :  { %v299_v1 = vld [vmem:[#allocation2 + $0x28] sm:$0xff] }
  0x9e   :  { %v284_v5 = vld [vmem:[#allocation2 + $0x10] sm:$0xff] }
 0x126   :  { %v279_v60 = vpop.xlane.xlu0 %278 }
 0x127   :  { %v153_v61 = vpop.xlane.xlu1 %152 }
 0x128   :  { %v280_v62 = vadd.f32 %v279_v60, %v153_v61 }
 0x12a   :  { %v281_v63 = vmul.f32 0.0015432099, %v280_v62 }
 0x12c   :  { %v300_v2 = vsub.f32 %v472_v47, %v281_v63  ;;  %v301_v3 = vsub.f32 %v474_v48, %v281_v63  ;;  %v302_v4 = vsub.f32 %v299_v1, %v281_v63  ;;  %v285_v6 = vsub.f32 %v142_v51, %v281_v63 }
 0x12d   :  { %v286_v7 = vsub.f32 %v143_v52, %v281_v63  ;;  %v287_v8 = vsub.f32 %v284_v5, %v281_v63 }
 0x12e   :  { %v303_v9 = vmul.f32 %v300_v2, %v300_v2  ;;  %v304_v10 = vmul.f32 %v301_v3, %v301_v3  ;;  %v305_v11 = vmul.f32 %v302_v4, %v302_v4  ;;  %v288_v12 = vmul.f32 %v285_v6, %v285_v6 }
 0x12f   :  { %v289_v13 = vmul.f32 %v286_v7, %v286_v7  ;;  %v290_v14 = vmul.f32 %v287_v8, %v287_v8 }
 0x130   :  { %v306_v15 = vadd.f32 %v304_v10, %v303_v9  ;;  %v307_v16 = vsel %vm147_vm0, %v305_v11, 0.0 }
 0x131   :  { %v291_v17 = vadd.f32 %v289_v13, %v288_v12  ;;  %v292_v18 = vsel %vm147_vm0, %v290_v14, 0.0 }
 0x132   :  { %v308_v19 = vadd.f32 %v307_v16, %v306_v15 }
 0x133   :  { %v293_v20 = vadd.f32 %v292_v18, %v291_v17 }
 0x134   :  { %309 = vadd.xlane.f32.xlu1 %v308_v19 }
 0x135   :  { %294 = vadd.xlane.f32.xlu0 %v293_v20 }
 0x1c1   :  { %v310_v22 = vpop.xlane.xlu1 %309 }
 0x1c2   :  { %v295_v23 = vpop.xlane.xlu0 %294 }
 0x1c3   :  { %v311_v24 = vadd.f32 %v310_v22, %v295_v23 }
 0x1c5   :  { %v312_v25 = vmul.f32 0.0015432099, %v311_v24 }
 0x1c7   :  { %v313_v26 = vadd.f32 1e-05, %v312_v25 }
 0x1c9   :  { %388 = vrsqrt.f32 %v313_v26 }
 0x1d3   :  { %v389_v28 = vpop.eup %388 }
 0x1d4   :  { %v315_v29 = vmul.f32 %v389_v28, %v442_v0 }
 0x1d6   :  { %324 = vperm.xlu1 %385, %v315_v29   ;;  %v316_v30 = vmul.f32 %v315_v29, %v281_v63 }
 0x1d8   :  { %318 = vrot.lane.b32.xlu0 %v316_v30, %s420_s0 }
 0x1da   :  { %386 = vset.pattern.permute.xlu1 %v419_v27 }
 0x24a   :  { %v319_v31 = vpop.permute.xlu0 %318 }
 0x24b   :  { %v321_v32 = vsub.f32 %v442_v0, %v319_v31 }
 0x24d   :  { %332 = vperm.xlu1 %386, %v321_v32  }
 0x255   :  { %v325_v33 = vpop.permute.xlu1 %324 }
 0x256   :  { %v327_v34 = vmul.f32 %v325_v33, %v142_v51  ;;  %v328_v35 = vmul.f32 %v325_v33, %v143_v52  ;;  %v329_v36 = vmul.f32 %v325_v33, %v284_v5  ;;  %v344_v37 = vmul.f32 %v325_v33, %v472_v47 }
 0x257   :  { %v345_v38 = vmul.f32 %v325_v33, %v474_v48  ;;  %v346_v39 = vmul.f32 %v325_v33, %v299_v1 }
 0x2cc   :  { %v333_v40 = vpop.permute.xlu1 %332 }
 0x2cd   :  { %v335_v41 = vadd.f32 %v333_v40, %v327_v34  ;;  %v336_v42 = vadd.f32 %v333_v40, %v328_v35  ;;  %v337_v43 = vadd.f32 %v333_v40, %v329_v36  ;;  %v347_v44 = vadd.f32 %v344_v37, %v333_v40 }
 0x2ce   :  { %v348_v45 = vadd.f32 %v345_v38, %v333_v40  ;;  %v349_v0 = vadd.f32 %v346_v39, %v333_v40 }
 0x2cf   :  { %338 = vst [vmem:[#allocation2] sm:$0xff] %v335_v41  ;;  %339 = vst [vmem:[#allocation2 + $0x8] sm:$0xff] %v336_v42 }
 0x2d0   :  { %340 = vst.msk [vmem:[#allocation2 + $0x10] sm:$0xff] %vm147_vm0, %v337_v43  ;;  %350 = vst [vmem:[#allocation2 + $0x18] sm:$0xff] %v347_v44 }
 0x2d1   :  { %351 = vst [vmem:[#allocation2 + $0x20] sm:$0xff] %v348_v45  ;;  %352 = vst.msk [vmem:[#allocation2 + $0x28] sm:$0xff] %vm147_vm0, %v349_v0 }
 0x2d2   :  { %401 = shalt.err (!%p398_p4)
}
 0x2d3   :  { %s402_s23 = scalar_lea.hbm %s506_s2, 768 }
 0x2d4   :  { %p403_p5 = scmp.ne.s32.totalorder %s506_s2, %s402_s23  ;;  %p406_p6 = scmp.lt.u32.totalorder %s402_s23, %s506_s2 }
 0x2d6   :  { %p408_p7 = pnand %p406_p6, %p403_p5 }
 0x2d8   :  { %411 = shalt.err (!%p408_p7)
}
 0x2d9   :  { %s422_s28 = smov 384   ;;  %s423_s29 = smov 24  }
 0x2da   :  { %364 = dma.vmem_to_hbm [thread:$0]  %s359_s19, 768, %s506_s2, [#allocation3], %s422_s28, %s422_s28, %s423_s29  }
 0x2db   :  { %412 = dma.done.wait [#allocation3], 768  }
 0x2dc   :  { %413 = vsyncadd [#allocation3], 4294966528 }
 0x2dd   :  { %368 = vsyncpa [#allocation3], 1 }

</bundles_post_ra>
